<compile_context>
chip_gen: v7x
topology: tpu7x:2x2x1
jax: 0.10.0
libtpu: 0.0.40
codegen_flags: <defaults>
</compile_context>

<pallas_src>
import math

import jax
import jax.numpy as jnp
from jax.experimental import pallas as pl
from jax.experimental.pallas import tpu as pltpu

OBS_DIM = 1 + 1 + 3 + 8 * 8   # 69
ACT_DIM = 3
IN_DIM = OBS_DIM + ACT_DIM    # 72
HID = 256


def _round_up(x, m):
    return ((x + m - 1) // m) * m


def critic_kernel(obs_ref, act_ref, w1o_ref, w1a_ref, b1_ref,
                  w2_ref, b2_ref, w3t_ref, b3_ref, q_ref):
    # fc1: cat([obs, act]) @ W1  ==  obs @ W1_obs + act @ W1_act.
    # obs part: bf16 MXU operands (cast in-kernel on the VPU), f32 accumulation.
    h1 = jnp.dot(obs_ref[...].astype(jnp.bfloat16), w1o_ref[...],
                 preferred_element_type=jnp.float32)
    # act part (K=3): f32 VPU FMAs — avoids a second, >97%-idle MXU weight pass
    # and keeps the act contribution at full precision.
    act = act_ref[...]                       # (tb, ACT_DIM) f32
    w1a = w1a_ref[...]                       # (ACT_DIM, HID) f32
    for k in range(ACT_DIM):
        h1 = h1 + act[:, k:k + 1] * w1a[k:k + 1, :]
    h1 = jnp.maximum(h1 + b1_ref[...], 0.0)  # bias + ReLU on the f32 accumulator

    # fc2 + ReLU (bf16 MXU operands, f32 accumulation).
    h2 = jnp.dot(h1.astype(jnp.bfloat16), w2_ref[...],
                 preferred_element_type=jnp.float32)
    h2 = jnp.maximum(h2 + b2_ref[...], 0.0)

    # q head (N=1, no activation): VPU multiply + XLU lane-reduce in f32, then a
    # narrow (tb, 1) store (contiguous 4 B/row in HBM, no 128-lane padding).
    q = jnp.sum(h2 * w3t_ref[...], axis=-1, keepdims=True)
    q_ref[...] = q + b3_ref[...]


def prepare_params(params):
    """One-time weight prep, hoisted out of the per-forward path."""
    w1, b1, w2, b2, w3, b3 = params
    w1o = w1[:OBS_DIM, :].astype(jnp.bfloat16)        # (69, 256)  MXU operand
    w1a = w1[OBS_DIM:, :].astype(jnp.float32)         # (3, 256)   VPU operand
    w2b = w2.astype(jnp.bfloat16)                     # (256, 256) MXU operand
    w3t = w3.T.astype(jnp.float32)                    # (1, 256)   VPU operand
    b1f = b1.astype(jnp.float32).reshape(1, HID)
    b2f = b2.astype(jnp.float32).reshape(1, HID)
    b3f = b3.astype(jnp.float32).reshape(1, 1)
    return (w1o, w1a, b1f, w2b, b2f, w3t, b3f)


def critic_forward(obs, act, prepared, tile_b=1024):
    """obs: (B, OBS_DIM) f32, act: (B, ACT_DIM) f32 -> q: (B, 1) f32."""
    w1o, w1a, b1f, w2b, b2f, w3t, b3f = prepared
    B = obs.shape[0]

    # Batch tile: <= tile_b rows, multiple of 16 (bf16 sublane packing), and
    # sized so the batch splits into >= 2 tiles when possible (v7x megacore).
    tb = min(tile_b, _round_up(pl.cdiv(B, 2), 16))
    tb = max(tb, 16)
    num_tiles = pl.cdiv(B, tb)
    Bp = num_tiles * tb
    if Bp != B:
        obs = jnp.pad(obs, ((0, Bp - B), (0, 0)))
        act = jnp.pad(act, ((0, Bp - B), (0, 0)))

    def resident(shape):                              # weights: same block every step
        return pl.BlockSpec(shape, lambda i: (0, 0))

    q_full = pl.pallas_call(
        critic_kernel,
        out_shape=jax.ShapeDtypeStruct((Bp, 1), jnp.float32),
        grid=(num_tiles,),
        in_specs=[
            pl.BlockSpec((tb, OBS_DIM), lambda i: (i, 0)),
            pl.BlockSpec((tb, ACT_DIM), lambda i: (i, 0)),
            resident((OBS_DIM, HID)),     # w1o (bf16)
            resident((ACT_DIM, HID)),     # w1a (f32)
            resident((1, HID)),           # b1
            resident((HID, HID)),         # w2  (bf16)
            resident((1, HID)),           # b2
            resident((1, HID)),           # w3^T (f32)
            resident((1, 1)),             # b3
        ],
        out_specs=pl.BlockSpec((tb, 1), lambda i: (i, 0)),
        compiler_params=pltpu.CompilerParams(
            dimension_semantics=("parallel",)),       # v7x: shard tiles across 2 TCs
    )(obs, act, w1o, w1a, b1f, w2b, b2f, w3t, b3f)

    return q_full if Bp == B else q_full[:B]


def init_params(key):
    """Deterministic init matching nn.Linear's default U(-1/sqrt(fan_in), +)."""
    ks = jax.random.split(key, 6)

    def linear(kw, kb, fan_in, fan_out):
        bound = 1.0 / math.sqrt(fan_in)
        w = jax.random.uniform(kw, (fan_in, fan_out), jnp.float32, -bound, bound)
        b = jax.random.uniform(kb, (1, fan_out), jnp.float32, -bound, bound)
        return w, b

    w1, b1 = linear(ks[0], ks[1], IN_DIM, HID)
    w2, b2 = linear(ks[2], ks[3], HID, HID)
    w3, b3 = linear(ks[4], ks[5], HID, 1)
    return (w1, b1, w2, b2, w3, b3)


if __name__ == "__main__":
    key = jax.random.PRNGKey(0)
    k_obs, k_act, k_par = jax.random.split(key, 3)

    B = 8
    obs = jax.random.normal(k_obs, (B, OBS_DIM), jnp.float32)
    act = jax.random.normal(k_act, (B, ACT_DIM), jnp.float32)
    params = init_params(k_par)
    prepared = prepare_params(params)     # one-time weight prep (per update in SAC)

    q = critic_forward(obs, act, prepared)
    jax.block_until_ready(q)

    # Reference in plain f32 JAX; kernel uses bf16 MXU operands for obs/fc2 with
    # f32 accumulation (act and q-head paths are full f32), so tolerance is loose.
    w1, b1, w2, b2, w3, b3 = params
    xa = jnp.concatenate([obs, act], axis=-1)
    h1 = jnp.maximum(xa @ w1 + b1, 0.0)
    h2 = jnp.maximum(h1 @ w2 + b2, 0.0)
    q_ref = h2 @ w3 + b3

    assert q.shape == (B, 1)
    assert jnp.allclose(q, q_ref, atol=5e-2, rtol=5e-2), \
        float(jnp.max(jnp.abs(q - q_ref)))

    # TODO(synk): SAC's twin critics (Q1/Q2) could be fused into one pallas_call
    # by stacking weights along the output dim (halves obs/act DMA traffic and
    # launch overhead), but that changes this single-Critic module's interface.
    print("KERNEL_OK")
</pallas_src>

<mosaic_0001>
module attributes {stable_mosaic.version = 11 : i64} {
  func.func @critic_kernel(%arg0: i32, %arg1: memref<16x69xf32, #tpu.memory_space<vmem>>, %arg2: memref<16x3xf32, #tpu.memory_space<vmem>>, %arg3: memref<69x256xbf16, #tpu.memory_space<vmem>>, %arg4: memref<3x256xf32, #tpu.memory_space<vmem>>, %arg5: memref<1x256xf32, #tpu.memory_space<vmem>>, %arg6: memref<256x256xbf16, #tpu.memory_space<vmem>>, %arg7: memref<1x256xf32, #tpu.memory_space<vmem>>, %arg8: memref<1x256xf32, #tpu.memory_space<vmem>>, %arg9: memref<1x1xf32, #tpu.memory_space<vmem>>, %arg10: memref<16x1xf32, #tpu.memory_space<vmem>>) attributes {dimension_semantics = [#tpu.dimension_semantics<parallel>], iteration_bounds = array<i64: 1>, scalar_prefetch = 0 : i64, scratch_operands = 0 : i64, tpu.core_type = #tpu.core_type<tc>, window_params = [{transform_indices = @transform_0, window_bounds = array<i64: 16, 69>}, {transform_indices = @transform_1, window_bounds = array<i64: 16, 3>}, {pipeline_mode = #tpu.pipeline_mode<synchronous>, transform_indices = @transform_2, window_bounds = array<i64: 69, 256>}, {pipeline_mode = #tpu.pipeline_mode<synchronous>, transform_indices = @transform_3, window_bounds = array<i64: 3, 256>}, {pipeline_mode = #tpu.pipeline_mode<synchronous>, transform_indices = @transform_4, window_bounds = array<i64: 1, 256>}, {pipeline_mode = #tpu.pipeline_mode<synchronous>, transform_indices = @transform_5, window_bounds = array<i64: 256, 256>}, {pipeline_mode = #tpu.pipeline_mode<synchronous>, transform_indices = @transform_6, window_bounds = array<i64: 1, 256>}, {pipeline_mode = #tpu.pipeline_mode<synchronous>, transform_indices = @transform_7, window_bounds = array<i64: 1, 256>}, {pipeline_mode = #tpu.pipeline_mode<synchronous>, transform_indices = @transform_8, window_bounds = array<i64: 1, 1>}, {transform_indices = @transform_9, window_bounds = array<i64: 16, 1>}]} {
    %c0 = arith.constant 0 : index
    %c0_0 = arith.constant 0 : index
    %0 = vector.load %arg1[%c0, %c0_0] : memref<16x69xf32, #tpu.memory_space<vmem>>, vector<16x69xf32>
    %1 = arith.truncf %0 : vector<16x69xf32> to vector<16x69xbf16>
    %c0_1 = arith.constant 0 : index
    %c0_2 = arith.constant 0 : index
    %2 = vector.load %arg3[%c0_1, %c0_2] : memref<69x256xbf16, #tpu.memory_space<vmem>>, vector<69x256xbf16>
    %cst = arith.constant dense<0.000000e+00> : vector<16x256xf32>
    %3 = tpu.matmul %1, %2, %cst {dimension_numbers = #tpu.dot_dimension_numbers<[1], [0], [0], [1], [0, 0, 1, 1], [], []>} : vector<16x69xbf16>, vector<69x256xbf16>, vector<16x256xf32> -> vector<16x256xf32>
    %c0_3 = arith.constant 0 : index
    %c0_4 = arith.constant 0 : index
    %4 = vector.load %arg2[%c0_3, %c0_4] : memref<16x3xf32, #tpu.memory_space<vmem>>, vector<16x3xf32>
    %c0_5 = arith.constant 0 : index
    %c0_6 = arith.constant 0 : index
    %5 = vector.load %arg4[%c0_5, %c0_6] : memref<3x256xf32, #tpu.memory_space<vmem>>, vector<3x256xf32>
    %6 = vector.extract_strided_slice %4 {offsets = [0, 0], sizes = [16, 1], strides = [1, 1]} : vector<16x3xf32> to vector<16x1xf32>
    %7 = vector.extract_strided_slice %5 {offsets = [0, 0], sizes = [1, 256], strides = [1, 1]} : vector<3x256xf32> to vector<1x256xf32>
    %8 = vector.broadcast %6 : vector<16x1xf32> to vector<16x256xf32>
    %9 = vector.broadcast %7 : vector<1x256xf32> to vector<16x256xf32>
    %10 = arith.mulf %8, %9 : vector<16x256xf32>
    %11 = arith.addf %3, %10 : vector<16x256xf32>
    %12 = vector.extract_strided_slice %4 {offsets = [0, 1], sizes = [16, 1], strides = [1, 1]} : vector<16x3xf32> to vector<16x1xf32>
    %13 = vector.extract_strided_slice %5 {offsets = [1, 0], sizes = [1, 256], strides = [1, 1]} : vector<3x256xf32> to vector<1x256xf32>
    %14 = vector.broadcast %12 : vector<16x1xf32> to vector<16x256xf32>
    %15 = vector.broadcast %13 : vector<1x256xf32> to vector<16x256xf32>
    %16 = arith.mulf %14, %15 : vector<16x256xf32>
    %17 = arith.addf %11, %16 : vector<16x256xf32>
    %18 = vector.extract_strided_slice %4 {offsets = [0, 2], sizes = [16, 1], strides = [1, 1]} : vector<16x3xf32> to vector<16x1xf32>
    %19 = vector.extract_strided_slice %5 {offsets = [2, 0], sizes = [1, 256], strides = [1, 1]} : vector<3x256xf32> to vector<1x256xf32>
    %20 = vector.broadcast %18 : vector<16x1xf32> to vector<16x256xf32>
    %21 = vector.broadcast %19 : vector<1x256xf32> to vector<16x256xf32>
    %22 = arith.mulf %20, %21 : vector<16x256xf32>
    %23 = arith.addf %17, %22 : vector<16x256xf32>
    %c0_7 = arith.constant 0 : index
    %c0_8 = arith.constant 0 : index
    %24 = vector.load %arg5[%c0_7, %c0_8] : memref<1x256xf32, #tpu.memory_space<vmem>>, vector<1x256xf32>
    %25 = vector.broadcast %24 : vector<1x256xf32> to vector<16x256xf32>
    %26 = arith.addf %23, %25 : vector<16x256xf32>
    %cst_9 = arith.constant 0.000000e+00 : f32
    %27 = vector.broadcast %cst_9 : f32 to vector<16x256xf32>
    %28 = arith.maximumf %26, %27 : vector<16x256xf32>
    %29 = arith.truncf %28 : vector<16x256xf32> to vector<16x256xbf16>
    %c0_10 = arith.constant 0 : index
    %c0_11 = arith.constant 0 : index
    %30 = vector.load %arg6[%c0_10, %c0_11] : memref<256x256xbf16, #tpu.memory_space<vmem>>, vector<256x256xbf16>
    %cst_12 = arith.constant dense<0.000000e+00> : vector<16x256xf32>
    %31 = tpu.matmul %29, %30, %cst_12 {dimension_numbers = #tpu.dot_dimension_numbers<[1], [0], [0], [1], [0, 0, 1, 1], [], []>} : vector<16x256xbf16>, vector<256x256xbf16>, vector<16x256xf32> -> vector<16x256xf32>
    %c0_13 = arith.constant 0 : index
    %c0_14 = arith.constant 0 : index
    %32 = vector.load %arg7[%c0_13, %c0_14] : memref<1x256xf32, #tpu.memory_space<vmem>>, vector<1x256xf32>
    %33 = vector.broadcast %32 : vector<1x256xf32> to vector<16x256xf32>
    %34 = arith.addf %31, %33 : vector<16x256xf32>
    %cst_15 = arith.constant 0.000000e+00 : f32
    %35 = vector.broadcast %cst_15 : f32 to vector<16x256xf32>
    %36 = arith.maximumf %34, %35 : vector<16x256xf32>
    %c0_16 = arith.constant 0 : index
    %c0_17 = arith.constant 0 : index
    %37 = vector.load %arg8[%c0_16, %c0_17] : memref<1x256xf32, #tpu.memory_space<vmem>>, vector<1x256xf32>
    %38 = vector.broadcast %37 : vector<1x256xf32> to vector<16x256xf32>
    %39 = arith.mulf %36, %38 : vector<16x256xf32>
    %cst_18 = arith.constant dense<0.000000e+00> : vector<16xf32>
    %40 = vector.multi_reduction <add>, %39, %cst_18 [1] : vector<16x256xf32> to vector<16xf32>
    %41 = vector.shape_cast %40 : vector<16xf32> to vector<16x1xf32>
    %c0_19 = arith.constant 0 : index
    %c0_20 = arith.constant 0 : index
    %42 = vector.load %arg9[%c0_19, %c0_20] : memref<1x1xf32, #tpu.memory_space<vmem>>, vector<1x1xf32>
    %43 = vector.broadcast %42 : vector<1x1xf32> to vector<16x1xf32>
    %44 = arith.addf %41, %43 : vector<16x1xf32>
    %c0_21 = arith.constant 0 : index
    %c0_22 = arith.constant 0 : index
    %45 = vector.load %arg10[%c0_21, %c0_22] : memref<16x1xf32, #tpu.memory_space<vmem>>, vector<16x1xf32>
    tpu.vector_store %arg10[%c0_21, %c0_22], %44 {strides = array<i32>} : memref<16x1xf32, #tpu.memory_space<vmem>>, vector<16x1xf32>,
    return
  }
  func.func @transform_0(%arg0: i32) -> (i32, i32) {
    %c0_i32 = arith.constant 0 : i32
    %c0_i32_0 = arith.constant 0 : i32
    return %arg0, %c0_i32 : i32, i32
  }
  func.func @transform_1(%arg0: i32) -> (i32, i32) {
    %c0_i32 = arith.constant 0 : i32
    %c0_i32_0 = arith.constant 0 : i32
    return %arg0, %c0_i32 : i32, i32
  }
  func.func @transform_2(%arg0: i32) -> (i32, i32) {
    %c0_i32 = arith.constant 0 : i32
    %c0_i32_0 = arith.constant 0 : i32
    %c0_i32_1 = arith.constant 0 : i32
    return %c0_i32, %c0_i32_0 : i32, i32
  }
  func.func @transform_3(%arg0: i32) -> (i32, i32) {
    %c0_i32 = arith.constant 0 : i32
    %c0_i32_0 = arith.constant 0 : i32
    %c0_i32_1 = arith.constant 0 : i32
    return %c0_i32, %c0_i32_0 : i32, i32
  }
  func.func @transform_4(%arg0: i32) -> (i32, i32) {
    %c0_i32 = arith.constant 0 : i32
    %c0_i32_0 = arith.constant 0 : i32
    %c0_i32_1 = arith.constant 0 : i32
    return %c0_i32, %c0_i32_0 : i32, i32
  }
  func.func @transform_5(%arg0: i32) -> (i32, i32) {
    %c0_i32 = arith.constant 0 : i32
    %c0_i32_0 = arith.constant 0 : i32
    %c0_i32_1 = arith.constant 0 : i32
    return %c0_i32, %c0_i32_0 : i32, i32
  }
  func.func @transform_6(%arg0: i32) -> (i32, i32) {
    %c0_i32 = arith.constant 0 : i32
    %c0_i32_0 = arith.constant 0 : i32
    %c0_i32_1 = arith.constant 0 : i32
    return %c0_i32, %c0_i32_0 : i32, i32
  }
  func.func @transform_7(%arg0: i32) -> (i32, i32) {
    %c0_i32 = arith.constant 0 : i32
    %c0_i32_0 = arith.constant 0 : i32
    %c0_i32_1 = arith.constant 0 : i32
    return %c0_i32, %c0_i32_0 : i32, i32
  }
  func.func @transform_8(%arg0: i32) -> (i32, i32) {
    %c0_i32 = arith.constant 0 : i32
    %c0_i32_0 = arith.constant 0 : i32
    %c0_i32_1 = arith.constant 0 : i32
    return %c0_i32, %c0_i32_0 : i32, i32
  }
  func.func @transform_9(%arg0: i32) -> (i32, i32) {
    %c0_i32 = arith.constant 0 : i32
    %c0_i32_0 = arith.constant 0 : i32
    return %arg0, %c0_i32 : i32, i32
  }
}

</mosaic_0001>

<bundles_post_ra>
// kernel: tpu_custom_call.1
= control target key start
LH: loop header
LB: loop body
LE: loop exit
PB: predicated region body
PF: predicated region fallthrough
CT: control target
= control target key end

     0   :  { %s891_s0 = inlined_call_operand.vmem [shape: f32[16,69], index: 0, kind: input, shape index: {}]   ;;  %s892_s1 = inlined_call_operand.vmem [shape: f32[16,3], index: 1, kind: input, shape index: {}]   ;;  %s893_s2 = inlined_call_operand.hbm [shape: bf16[69,256], index: 2, kind: input, shape index: {}]   ;;  %s894_s3 = inlined_call_operand.vmem [shape: f32[3,256], index: 3, kind: input, shape index: {}]   ;;  %s895_s4 = inlined_call_operand.vmem [shape: f32[1,256], index: 4, kind: input, shape index: {}]   ;;  %s896_s5 = inlined_call_operand.hbm [shape: bf16[256,256], index: 5, kind: input, shape index: {}]   ;;  %s897_s6 = inlined_call_operand.vmem [shape: f32[1,256], index: 6, kind: input, shape index: {}]   ;;  %s898_s7 = inlined_call_operand.vmem [shape: f32[1,256], index: 7, kind: input, shape index: {}]   ;;  %s899_s8 = inlined_call_operand.<no memory space> [shape: f32[1,1], index: 8, kind: input, shape index: {}]   ;;  %s900_s9 = inlined_call_operand.vmem [shape: f32[16,1], index: 9, kind: output, shape index: {}]  }
   0x1   :  { %v14_v0 = vstv %s899_s8 }
   0x2   :  { %15 = vst [vmem:[#allocation2] sm:$0x1] %v14_v0 }
   0x3   :  { %16 = vsyncpa [#allocation4], 0 }
   0x4   :  { %17 = vsyncpa [#allocation6], 0  ;;  %s760_s11 = smov [#allocation3]   ;;  %s712_s15 = scalar_lea.hbm %s893_s2, 1152 }
   0x5   :  { %s27_s12 = sshll.u32 %s760_s11, 4  ;;  %p713_p0 = scmp.ne.s32.totalorder %s893_s2, %s712_s15  ;;  %s28_s12 = int_to_ptr.vmem [resolvable:$true] %s27_s12 }
   0x6   :  { %p716_p1 = scmp.lt.u32.totalorder %s712_s15, %s893_s2 }
   0x8   :  { %p718_p2 = pnand %p716_p1, %p713_p0 }
   0xa   :  { %721 = shalt.err (!%p718_p2)
}
   0xb   :  { %s722_s8 = scalar_lea.vmem %s28_s12, 1152  ;;  %p727_p4 = scmp.lt.s32.totalorder %s28_s12, %s28_s12 }
   0xc   :  { %p723_p3 = scmp.ne.s32.totalorder %s28_s12, %s722_s8  ;;  %p728_p5 = scmp.lt.s32.totalorder %s722_s8, %s722_s8 }
   0xe   :  { %p729_p6 = por %p728_p5, %p727_p4 }
  0x10   :  { %p730_p7 = pnand %p729_p6, %p723_p3 }
  0x12   :  { %733 = shalt.err (!%p730_p7)
}
  0x13   :  { %s761_s20 = smov 128   ;;  %s762_s21 = smov 8  }
  0x14   :  { %33 = dma.hbm_to_vmem [thread:$0]  %s893_s2, 1152, %s28_s12, [#allocation4], %s761_s20, %s761_s20, %s762_s21  }
  0x15   :  { %s763_s24 = smov [#allocation5]   ;;  %s734_s28 = scalar_lea.hbm %s896_s5, 4096 }
  0x16   :  { %s43_s25 = sshll.u32 %s763_s24, 4  ;;  %p735_p8 = scmp.ne.s32.totalorder %s896_s5, %s734_s28  ;;  %s44_s25 = int_to_ptr.vmem [resolvable:$true] %s43_s25 }
  0x17   :  { %p738_p9 = scmp.lt.u32.totalorder %s734_s28, %s896_s5 }
  0x19   :  { %p740_p10 = pnand %p738_p9, %p735_p8 }
  0x1b   :  { %743 = shalt.err (!%p740_p10)
}
  0x1c   :  { %s744_s13 = scalar_lea.vmem %s44_s25, 4096  ;;  %p749_p12 = scmp.lt.s32.totalorder %s44_s25, %s44_s25 }
  0x1d   :  { %p745_p11 = scmp.ne.s32.totalorder %s44_s25, %s744_s13  ;;  %p750_p13 = scmp.lt.s32.totalorder %s744_s13, %s744_s13 }
  0x1f   :  { %p751_p0 = por %p750_p13, %p749_p12 }
  0x21   :  { %p752_p1 = pnand %p751_p0, %p745_p11 }
  0x23   :  { %755 = shalt.err (!%p752_p1)
}
  0x24   :  { %49 = dma.hbm_to_vmem [thread:$0]  %s896_s5, 4096, %s44_s25, [#allocation6], %s761_s20, %s761_s20, %s762_s21  }
  0x25   :  { %756 = dma.done.wait [#allocation4], 1152  }
  0x26   :  { %757 = vsyncadd [#allocation4], 4294966144 }
  0x27   :  { %758 = dma.done.wait [#allocation6], 4096  }
  0x28   :  { %759 = vsyncadd [#allocation6], 4294963200  ;;  %v764_v1 = vmov 0   ;;  %v765_v2 = vmov 1   ;;  %v650_v3 = vld [vmem:[#allocation3 + $0x4] ss:$8 sps:$4 sm:$0xff]   ;;  %v89_v57 = vlaneseq }
  0x29   :  { %202 = vmatprep.mubr.bf16.mxu0 %v764_v1  ;;  %646 = vset.pattern.permute.xlu0 %v764_v1  ;;  %v652_v4 = vld [vmem:[#allocation3] ss:$8 sps:$4 sm:$0xff]   ;;  %v653_v5 = vld [vmem:[#allocation3 + $0x14] ss:$8 sps:$4 sm:$0xff]   ;;  %v655_v6 = vld [vmem:[#allocation3 + $0x10] ss:$8 sps:$4 sm:$0xff]  }
  0x2a   :  { %647 = vset.pattern.permute.xlu1 %v765_v2  ;;  %170 = vmatprep.subr.bf16.mxu0 %v650_v3  ;;  %vm160_vm0 = vcmask 1041408   ;;  %v656_v7 = vld [vmem:[#allocation3 + $0x24] ss:$8 sps:$4 sm:$0xff]   ;;  %v658_v8 = vld [vmem:[#allocation3 + $0x20] ss:$8 sps:$4 sm:$0xff]   ;;  %vm161_vm1 = vcmask 1042432  }
  0x2b   :  { %171 = vmatpush1.bf16.msra.mxu0 %v652_v4  ;;  %v74_v9 = vld [vmem:[#allocation3 + $0x40] sm:$0x77]  ;;  %v659_v10 = vld [vmem:[#allocation3 + $0x34] ss:$8 sps:$4 sm:$0xff]   ;;  %v766_v11 = vmov 65535   ;;  %v76_v14 = vld [vmem:[%s892_s1 + $0x8] sm:$0xff] }
  0x2c   :  { %172 = vmatprep.subr.bf16.mxu0 %v653_v5  ;;  %v162_v12 = vsel %vm160_vm0, 4294967295, %v766_v11  ;;  %v75_v13 = vld [vmem:[%s892_s1] sm:$0xff]  ;;  %v664_v15 = vld [vmem:[#allocation5 + $0x4] ss:$8 sps:$4 sm:$0xff]   ;;  %v603_v16 = vcombine.high %v74_v9, %v74_v9  ;;  %v666_v17 = vld [vmem:[#allocation5] ss:$8 sps:$4 sm:$0xff]   ;;  %v602_v22 = vcombine.low %v74_v9, %v74_v9 }
  0x2d   :  { %214 = vperm.xlu1 %647, %v75_v13   ;;  %80 = vperm.xlu0 %646, %v75_v13   ;;  %v163_v18 = vsel %vm161_vm1, %v162_v12, 0  ;;  %v667_v19 = vld [vmem:[#allocation5 + $0x14] ss:$8 sps:$4 sm:$0xff]   ;;  %v669_v20 = vld [vmem:[#allocation5 + $0x10] ss:$8 sps:$4 sm:$0xff]   ;;  %v767_v28 = vmov 2  }
  0x2e   :  { %507 = vmatprep.subr.bf16.mxu1 %v664_v15  ;;  %v661_v21 = vld [vmem:[#allocation3 + $0x30] ss:$8 sps:$4 sm:$0xff]   ;;  %v168_v23 = vand.u32 %v603_v16, %v163_v18  ;;  %v63_v24 = vld [vmem:[%s891_s0] sm:$0xff]  ;;  %v64_v25 = vld [vmem:[%s891_s0 + $0x8] sm:$0xff]  ;;  %v165_v27 = vand.u32 %v602_v22, %v163_v18  ;;  %vm156_vm2 = vcmask 564224   ;;  %v90_v58 = vshrl.u32 %v89_v57, 7 }
  0x2f   :  { %173 = vmatpush1.bf16.msra.mxu0 %v655_v6  ;;  %508 = vmatpush1.bf16.msra.mxu1 %v666_v17  ;;  %v670_v26 = vld [vmem:[#allocation5 + $0x24] ss:$8 sps:$4 sm:$0xff]   ;;  %v672_v29 = vld [vmem:[#allocation5 + $0x20] ss:$8 sps:$4 sm:$0xff]   ;;  %v673_v30 = vld [vmem:[#allocation5 + $0x34] ss:$8 sps:$4 sm:$0xff]   ;;  %v65_v31 = vpack.c.bf16 %v64_v25, %v63_v24 }
  0x30   :  { %174 = vmatprep.subr.bf16.mxu0 %v656_v7  ;;  %509 = vmatprep.subr.bf16.mxu1 %v667_v19  ;;  %v675_v32 = vld [vmem:[#allocation5 + $0x30] ss:$8 sps:$4 sm:$0xff]   ;;  %v676_v33 = vld [vmem:[#allocation5 + $0x44] ss:$8 sps:$4 sm:$0xff]   ;;  %v678_v34 = vld [vmem:[#allocation5 + $0x40] ss:$8 sps:$4 sm:$0xff]  }
  0x31   :  { %218 = vperm.xlu1 %647, %v76_v14   ;;  %85 = vperm.xlu0 %646, %v76_v14   ;;  %v679_v35 = vld [vmem:[#allocation5 + $0x54] ss:$8 sps:$4 sm:$0xff]   ;;  %v681_v36 = vld [vmem:[#allocation5 + $0x50] ss:$8 sps:$4 sm:$0xff]   ;;  %v682_v37 = vld [vmem:[#allocation5 + $0x64] ss:$8 sps:$4 sm:$0xff]  }
  0x32   :  { %v684_v38 = vld [vmem:[#allocation5 + $0x60] ss:$8 sps:$4 sm:$0xff]   ;;  %v685_v39 = vld [vmem:[#allocation5 + $0x74] ss:$8 sps:$4 sm:$0xff]   ;;  %v687_v40 = vld [vmem:[#allocation5 + $0x70] ss:$8 sps:$4 sm:$0xff]  }
  0x33   :  { %175 = vmatpush1.bf16.msra.mxu0 %v658_v8  ;;  %510 = vmatpush1.bf16.msra.mxu1 %v669_v20  ;;  %v688_v41 = vld [vmem:[#allocation5 + $0x84] ss:$8 sps:$4 sm:$0xff]   ;;  %v690_v42 = vld [vmem:[#allocation5 + $0x80] ss:$8 sps:$4 sm:$0xff]   ;;  %v691_v43 = vld [vmem:[#allocation5 + $0x94] ss:$8 sps:$4 sm:$0xff]  }
  0x34   :  { %176 = vmatprep.subr.bf16.mxu0 %v659_v10  ;;  %511 = vmatprep.subr.bf16.mxu1 %v670_v26  ;;  %v693_v44 = vld [vmem:[#allocation5 + $0x90] ss:$8 sps:$4 sm:$0xff]   ;;  %v694_v45 = vld [vmem:[#allocation5 + $0xa4] ss:$8 sps:$4 sm:$0xff]   ;;  %v696_v46 = vld [vmem:[#allocation5 + $0xa0] ss:$8 sps:$4 sm:$0xff]  }
  0x35   :  { %649 = vset.pattern.permute.xlu1 %v767_v28  ;;  %648 = vset.pattern.permute.xlu0 %v767_v28  ;;  %v697_v47 = vld [vmem:[#allocation5 + $0xb4] ss:$8 sps:$4 sm:$0xff]   ;;  %v699_v48 = vld [vmem:[#allocation5 + $0xb0] ss:$8 sps:$4 sm:$0xff]   ;;  %v700_v49 = vld [vmem:[#allocation5 + $0xc4] ss:$8 sps:$4 sm:$0xff]  }
  0x36   :  { %248 = vperm.xlu0 %648, %v75_v13   ;;  %252 = vperm.xlu1 %649, %v76_v14   ;;  %v702_v50 = vld [vmem:[#allocation5 + $0xc0] ss:$8 sps:$4 sm:$0xff]   ;;  %v703_v51 = vld [vmem:[#allocation5 + $0xd4] ss:$8 sps:$4 sm:$0xff]   ;;  %v705_v52 = vld [vmem:[#allocation5 + $0xd0] ss:$8 sps:$4 sm:$0xff]  }
  0x37   :  { %177 = vmatpush1.bf16.msra.mxu0 %v661_v21  ;;  %512 = vmatpush1.bf16.msra.mxu1 %v672_v29  ;;  %v706_v53 = vld [vmem:[#allocation5 + $0xe4] ss:$8 sps:$4 sm:$0xff]   ;;  %v708_v54 = vld [vmem:[#allocation5 + $0xe0] ss:$8 sps:$4 sm:$0xff]   ;;  %v709_v55 = vld [vmem:[#allocation5 + $0xf4] ss:$8 sps:$4 sm:$0xff]  }
  0x38   :  { %178 = vmatprep.subr.bf16.mxu0 %v168_v23  ;;  %513 = vmatprep.subr.bf16.mxu1 %v673_v30  ;;  %v711_v56 = vld [vmem:[#allocation5 + $0xf0] ss:$8 sps:$4 sm:$0xff]   ;;  %v857_v59 = vsub.s32 0, %v90_v58  ;;  %v95_v61 = vsub.s32 4, %v90_v58  ;;  %v862_v63 = vsub.s32 1, %v90_v58  ;;  %v257_v0 = vsub.s32 2, %v90_v58 }
  0x39   :  { %v77_v60 = vld [vmem:[%s894_s3] sm:$0x77]  ;;  %v227_v1 = vsub.s32 5, %v90_v58  ;;  %v261_v3 = vsub.s32 6, %v90_v58  ;;  %vm585_vm3 = vcmask 7168  }
  0x3a   :  { %v92_v4 = vrot.slane %v77_v60, %v857_v59  ;;  %v96_v5 = vrot.slane %v77_v60, %v95_v61  ;;  %v224_v6 = vrot.slane %v77_v60, %v862_v63  ;;  %v258_v7 = vrot.slane %v77_v60, %v257_v0  ;;  %v281_v16 = vld [vmem:[%s895_s4] sm:$0x3] }
  0x3b   :  { %179 = vmatpush1.bf16.msra.mxu0 %v165_v27  ;;  %514 = vmatpush1.bf16.msra.mxu1 %v675_v32  ;;  %v228_v8 = vrot.slane %v77_v60, %v227_v1  ;;  %v262_v10 = vrot.slane %v77_v60, %v261_v3  ;;  %v286_v24 = vrot.slane %v281_v16, %v857_v59  ;;  %v554_v1 = vld [vmem:[%s898_s7] sm:$0x3] }
  0x3c   :  { %515 = vmatprep.subr.bf16.mxu1 %v676_v33  ;;  %v102_v11 = vrot.slane %v92_v4, %v857_v59  ;;  %v106_v12 = vrot.slane %v96_v5, %v857_v59  ;;  %v234_v14 = vrot.slane %v224_v6, %v862_v63  ;;  %v268_v15 = vrot.slane %v258_v7, %v257_v0 }
  0x3d   :  { %v238_v17 = vrot.slane %v228_v8, %v862_v63  ;;  %v272_v18 = vrot.slane %v262_v10, %v257_v0  ;;  %v290_v25 = vrot.slane %v281_v16, %v862_v63  ;;  %v559_v5 = vrot.slane %v554_v1, %v857_v59 }
  0x3e   :  { %604 = vmatmul.mubr.msk.bf16.vlgmr.msra.gmra.mrb[0].mxu0 %vm156_vm2, %v65_v31  ;;  %v563_v8 = vrot.slane %v554_v1, %v862_v63 }
  0x3f   :  { %516 = vmatpush1.bf16.msra.mxu1 %v678_v34 }
  0x40   :  { %517 = vmatprep.subr.bf16.mxu1 %v679_v35 }
  0x43   :  { %518 = vmatpush1.bf16.msra.mxu1 %v681_v36 }
  0x44   :  { %519 = vmatprep.subr.bf16.mxu1 %v682_v37 }
  0x47   :  { %520 = vmatpush1.bf16.msra.mxu1 %v684_v38 }
  0x48   :  { %521 = vmatprep.subr.bf16.mxu1 %v685_v39 }
  0x4b   :  { %522 = vmatpush1.bf16.msra.mxu1 %v687_v40 }
  0x4c   :  { %523 = vmatprep.subr.bf16.mxu1 %v688_v41 }
  0x4f   :  { %524 = vmatpush1.bf16.msra.mxu1 %v690_v42 }
  0x50   :  { %525 = vmatprep.subr.bf16.mxu1 %v691_v43 }
  0x53   :  { %526 = vmatpush1.bf16.msra.mxu1 %v693_v44 }
  0x54   :  { %527 = vmatprep.subr.bf16.mxu1 %v694_v45 }
  0x57   :  { %528 = vmatpush1.bf16.msra.mxu1 %v696_v46 }
  0x58   :  { %529 = vmatprep.subr.bf16.mxu1 %v697_v47 }
  0x5b   :  { %530 = vmatpush1.bf16.msra.mxu1 %v699_v48 }
  0x5c   :  { %531 = vmatprep.subr.bf16.mxu1 %v700_v49 }
  0x5f   :  { %532 = vmatpush1.bf16.msra.mxu1 %v702_v50 }
  0x60   :  { %533 = vmatprep.subr.bf16.mxu1 %v703_v51 }
  0x63   :  { %534 = vmatpush1.bf16.msra.mxu1 %v705_v52 }
  0x64   :  { %535 = vmatprep.subr.bf16.mxu1 %v706_v53 }
  0x67   :  { %536 = vmatpush1.bf16.msra.mxu1 %v708_v54 }
  0x68   :  { %537 = vmatprep.subr.bf16.mxu1 %v709_v55 }
  0x6b   :  { %538 = vmatpush1.bf16.msra.mxu1 %v711_v56 }
  0xac   :  { %v81_v62 = vpop.permute.xlu0 %80  ;;  %v215_v2 = vpop.permute.xlu1 %214 }
  0xad   :  { %v107_v20 = vmul.f32 %v102_v11, %v81_v62  ;;  %v108_v21 = vmul.f32 %v106_v12, %v81_v62  ;;  %v239_v26 = vmul.f32 %v234_v14, %v215_v2  ;;  %v240_v31 = vmul.f32 %v238_v17, %v215_v2  ;;  %v335_v62 = vld [vmem:[%s897_s6] sm:$0x3] }
  0xae   :  { %v340_v0 = vrot.slane %v335_v62, %v857_v59  ;;  %v344_v2 = vrot.slane %v335_v62, %v862_v63  ;;  %v637_v59 = vld [vmem:[#allocation2] ss:$0 sm:$0xff] }
  0xb0   :  { %v86_v9 = vpop.permute.xlu0 %85  ;;  %v219_v13 = vpop.permute.xlu1 %218 }
  0xb1   :  { %v109_v27 = vmul.f32 %v102_v11, %v86_v9  ;;  %v110_v32 = vmul.f32 %v106_v12, %v86_v9  ;;  %v241_v36 = vmul.f32 %v234_v14, %v219_v13  ;;  %v242_v41 = vmul.f32 %v238_v17, %v219_v13 }
  0xb5   :  { %v249_v19 = vpop.permute.xlu0 %248  ;;  %v253_v23 = vpop.permute.xlu1 %252 }
  0xb6   :  { %v273_v30 = vmul.f32 %v268_v15, %v249_v19  ;;  %v274_v34 = vmul.f32 %v272_v18, %v249_v19  ;;  %v275_v40 = vmul.f32 %v268_v15, %v253_v23  ;;  %v276_v44 = vmul.f32 %v272_v18, %v253_v23 }
 0x111   :  { %v204_v22 = vpop.f32.mrb[0].mxu0 }
 0x112   :  { %v205_v28 = vadd.f32 %v204_v22, %v107_v20  ;;  %v206_v29 = vpop.f32.mrb[1].mxu0 }
 0x113   :  { %v207_v33 = vadd.f32 %v206_v29, %v108_v21  ;;  %v208_v35 = vpop.f32.mrb[2].mxu0 }
 0x114   :  { %v243_v37 = vadd.f32 %v239_v26, %v205_v28  ;;  %v209_v38 = vadd.f32 %v208_v35, %v109_v27  ;;  %v210_v39 = vpop.f32.mrb[3].mxu0 }
 0x115   :  { %v244_v42 = vadd.f32 %v240_v31, %v207_v33  ;;  %v211_v43 = vadd.f32 %v210_v39, %v110_v32 }
 0x116   :  { %v277_v45 = vadd.f32 %v273_v30, %v243_v37  ;;  %v245_v46 = vadd.f32 %v241_v36, %v209_v38 }
 0x117   :  { %v278_v47 = vadd.f32 %v274_v34, %v244_v42  ;;  %v246_v48 = vadd.f32 %v242_v41, %v211_v43 }
 0x118   :  { %v279_v49 = vadd.f32 %v275_v40, %v245_v46  ;;  %v293_v50 = vadd.f32 %v286_v24, %v277_v45 }
 0x119   :  { %v280_v51 = vadd.f32 %v276_v44, %v246_v48  ;;  %v294_v52 = vadd.f32 %v290_v25, %v278_v47 }
 0x11a   :  { %v295_v53 = vadd.f32 %v286_v24, %v279_v49  ;;  %v297_v55 = vmax.f32 %v293_v50, 0.0 }
 0x11b   :  { %v296_v54 = vadd.f32 %v290_v25, %v280_v51  ;;  %v298_v57 = vmax.f32 %v294_v52, 0.0 }
 0x11c   :  { %v299_v56 = vmax.f32 %v295_v53, 0.0 }
 0x11d   :  { %v300_v58 = vmax.f32 %v296_v54, 0.0 }
 0x11e   :  { %v301_v60 = vpack.c.bf16 %v299_v56, %v297_v55 }
 0x11f   :  { %v302_v61 = vpack.c.bf16 %v300_v58, %v298_v57 }
 0x121   :  { %539 = vmatprep.mubr.bf16.mxu1 %v302_v61 }
 0x122   :  { %540 = vmatmul.mubr.bf16.vlgmr.msra.gmra.mrb[0].mxu1 %v301_v60 }
 0x1f5   :  { %v541_v3 = vpop.f32.mrb[0].mxu1 }
 0x1f6   :  { %v542_v4 = vadd.f32 %v541_v3, %v340_v0  ;;  %v543_v6 = vpop.f32.mrb[1].mxu1 }
 0x1f7   :  { %v544_v7 = vadd.f32 %v543_v6, %v344_v2  ;;  %v545_v9 = vpop.f32.mrb[2].mxu1 }
 0x1f8   :  { %v550_v10 = vmax.f32 %v542_v4, 0.0  ;;  %v546_v11 = vadd.f32 %v545_v9, %v340_v0  ;;  %v547_v12 = vpop.f32.mrb[3].mxu1 }
 0x1f9   :  { %v551_v13 = vmax.f32 %v544_v7, 0.0  ;;  %v548_v14 = vadd.f32 %v547_v12, %v344_v2 }
 0x1fa   :  { %v566_v15 = vmul.f32 %v559_v5, %v550_v10  ;;  %v552_v16 = vmax.f32 %v546_v11, 0.0 }
 0x1fb   :  { %v567_v17 = vmul.f32 %v563_v8, %v551_v13  ;;  %v553_v18 = vmax.f32 %v548_v14, 0.0 }
 0x1fc   :  { %v568_v19 = vmul.f32 %v559_v5, %v552_v16 }
 0x1fd   :  { %v569_v20 = vmul.f32 %v563_v8, %v553_v18  ;;  %v570_v21 = vadd.f32 %v567_v17, %v566_v15 }
 0x1ff   :  { %571 = vadd.xlane.f32.xlu1 %v570_v21  ;;  %v573_v22 = vadd.f32 %v569_v20, %v568_v19 }
 0x201   :  { %574 = vadd.xlane.f32.xlu0 %v573_v22 }
 0x28c   :  { %v572_v23 = vpop.xlane.xlu1 %571 }
 0x28d   :  { %v583_v63 = vadd.f32 %v637_v59, %v572_v23 }
 0x28e   :  { %v575_v24 = vpop.xlane.xlu0 %574 }
 0x28f   :  { %586 = vst.msk [vmem:[%s900_s9] sm:$0xff] %vm585_vm3, %v583_v63  ;;  %v584_v25 = vadd.f32 %v637_v59, %v575_v24 }
 0x291   :  { %587 = vst.msk [vmem:[%s900_s9 + $0x8] sm:$0xff] %vm585_vm3, %v584_v25 }
 0x292   :  { %592 = vsyncpa [#allocation4], 1 }
 0x293   :  { %593 = vsyncpa [#allocation6], 1 }

</bundles_post_ra>
